<compile_context>
chip_gen: v5e
topology: v5e:2x2
jax: 0.10.0
libtpu: 0.0.40
codegen_flags: <defaults>
</compile_context>

<pallas_src>
import jax
import jax.numpy as jnp
from jax.experimental import pallas as pl
from jax.experimental.pallas import tpu as pltpu


def linreg_kernel(x_ref, w_ref, b_ref, o_ref):
    # x_ref: (1, n_in)        flattened input, lane-dense along K
    # w_ref: (n_out, n_in)    original nn.Linear layout, lane-dense along K
    # b_ref: (1, n_out)       lane-dense bias
    # o_ref: (1, n_out)       lane-dense output
    prod = w_ref[...].astype(jnp.float32) * x_ref[...].astype(jnp.float32)  # VPU
    y_col = jnp.sum(prod, axis=-1, keepdims=True)        # (n_out, 1) XLU lane reduce
    y_row = jnp.transpose(y_col)                          # (1, n_out) small XLU transpose
    o_ref[...] = (y_row + b_ref[...].astype(jnp.float32)).astype(o_ref.dtype)


def linreg_forward(x, weight, bias):
    """x: any shape (fully flattened), weight: (n_out, n_in), bias: (n_out,)."""
    n_out, n_in = weight.shape
    if x.size != n_in:
        raise ValueError(
            f"LinRegNet flattens ALL dims into features: x.size={x.size} must "
            f"equal n_inputs={n_in} (batched inputs are not supported)."
        )
    x_row = jnp.reshape(x, (1, n_in))        # glue: flatten
    b_row = jnp.reshape(bias, (1, n_out))    # lane-dense bias

    vmem = pl.BlockSpec(memory_space=pltpu.MemorySpace.VMEM)
    out = pl.pallas_call(
        linreg_kernel,
        out_shape=jax.ShapeDtypeStruct((1, n_out), x.dtype),
        in_specs=[vmem, vmem, vmem],
        out_specs=vmem,
    )(x_row, weight, b_row)
    return jnp.reshape(out, (n_out,))


if __name__ == "__main__":
    # Small shapes consistent with the module: x = (2, 4, 16, 16) -> n_inputs = 2048.
    key = jax.random.PRNGKey(0)
    kx, kw, kb = jax.random.split(key, 3)

    x = jax.random.normal(kx, (2, 4, 16, 16), dtype=jnp.float32)
    n_inputs = x.size          # 2048
    n_outputs = 16

    # Deterministic nn.Linear-style init: U(-1/sqrt(n_in), 1/sqrt(n_in)).
    bound = 1.0 / jnp.sqrt(jnp.float32(n_inputs))
    weight = jax.random.uniform(
        kw, (n_outputs, n_inputs), minval=-bound, maxval=bound, dtype=jnp.float32
    )
    bias = jax.random.uniform(
        kb, (n_outputs,), minval=-bound, maxval=bound, dtype=jnp.float32
    )

    y = linreg_forward(x, weight, bias)
    y = jax.block_until_ready(y)

    # Reference check (plain JAX).
    y_ref = weight @ jnp.reshape(x, (-1,)) + bias
    assert y.shape == (n_outputs,)
    assert jnp.allclose(y, y_ref, atol=1e-5, rtol=1e-5), "mismatch vs reference"

    print("KERNEL_OK")
</pallas_src>

<mosaic_0001>
module attributes {stable_mosaic.version = 11 : i64} {
  func.func @linreg_kernel(%arg0: memref<1x2048xf32, #tpu.memory_space<vmem>>, %arg1: memref<16x2048xf32, #tpu.memory_space<vmem>>, %arg2: memref<1x16xf32, #tpu.memory_space<vmem>>, %arg3: memref<1x16xf32, #tpu.memory_space<vmem>>) attributes {dimension_semantics = [], scalar_prefetch = 0 : i64, scratch_operands = 0 : i64, tpu.core_type = #tpu.core_type<tc>} {
    %c0 = arith.constant 0 : index
    %c0_0 = arith.constant 0 : index
    %0 = vector.load %arg1[%c0, %c0_0] : memref<16x2048xf32, #tpu.memory_space<vmem>>, vector<16x2048xf32>
    %c0_1 = arith.constant 0 : index
    %c0_2 = arith.constant 0 : index
    %1 = vector.load %arg0[%c0_1, %c0_2] : memref<1x2048xf32, #tpu.memory_space<vmem>>, vector<1x2048xf32>
    %2 = vector.broadcast %1 : vector<1x2048xf32> to vector<16x2048xf32>
    %3 = arith.mulf %0, %2 : vector<16x2048xf32>
    %cst = arith.constant dense<0.000000e+00> : vector<16xf32>
    %4 = vector.multi_reduction <add>, %3, %cst [1] : vector<16x2048xf32> to vector<16xf32>
    %5 = vector.shape_cast %4 : vector<16xf32> to vector<16x1xf32>
    %6 = tpu.transpose %5, [1, 0] : vector<16x1xf32> -> vector<1x16xf32>
    %c0_3 = arith.constant 0 : index
    %c0_4 = arith.constant 0 : index
    %7 = vector.load %arg2[%c0_3, %c0_4] : memref<1x16xf32, #tpu.memory_space<vmem>>, vector<1x16xf32>
    %8 = arith.addf %6, %7 : vector<1x16xf32>
    %c0_5 = arith.constant 0 : index
    %c0_6 = arith.constant 0 : index
    %9 = vector.load %arg3[%c0_5, %c0_6] : memref<1x16xf32, #tpu.memory_space<vmem>>, vector<1x16xf32>
    tpu.vector_store %arg3[%c0_5, %c0_6], %8 {strides = array<i32>} : memref<1x16xf32, #tpu.memory_space<vmem>>, vector<1x16xf32>,
    return
  }
}

</mosaic_0001>

<bundles_post_ra>
// kernel: tpu_custom_call.1
= control target key start
LH: loop header
LB: loop body
LE: loop exit
PB: predicated region body
PF: predicated region fallthrough
CT: control target
= control target key end

     0   :  { %8 = vsyncpa [#allocation3], 0  ;;  %s374_s0 = inlined_call_operand.hbm [shape: f32[1,2048], index: 0, kind: input, shape index: {}]   ;;  %s375_s1 = inlined_call_operand.hbm [shape: f32[16,2048], index: 1, kind: input, shape index: {}]   ;;  %s376_s2 = inlined_call_operand.vmem [shape: f32[1,16], index: 2, kind: input, shape index: {}]   ;;  %s377_s3 = inlined_call_operand.hbm [shape: f32[1,16], index: 3, kind: output, shape index: {}]  }
   0x1   :  { %9 = vsyncpa [#allocation6], 0 }
   0x2   :  { %10 = vsyncpa [#allocation4], 0  ;;  %s16_s14 = sshll.u32 %s374_s0, 4  ;;  %s317_s15 = smov [#allocation2]   ;;  %s17_s14 = int_to_ptr.hbm [resolvable:$true] %s16_s14 }
   0x3   :  { %s18_s16 = sshll.u32 %s317_s15, 4  ;;  %s26_s19 = sshll.u32 %s375_s1, 4  ;;  %s19_s16 = int_to_ptr.vmem [resolvable:$true] %s18_s16  ;;  %s27_s19 = int_to_ptr.hbm [resolvable:$true] %s26_s19 }
   0x4   :  { %21 = dma.hbm_to_vmem [thread:$0]  %s17_s14, 256, %s19_s16, [#allocation3]  }
   0x5   :  { %s318_s20 = smov [#allocation5]   ;;  %s319_s22 = smov 2048  }
   0x6   :  { %s28_s21 = sshll.u32 %s318_s20, 4  ;;  %s320_s23 = smov 128   ;;  %s29_s21 = int_to_ptr.vmem [resolvable:$true] %s28_s21 }
   0x7   :  { %34 = dma.hbm_to_vmem [thread:$0]  %s27_s19, 4096, %s29_s21, [#allocation6], %s319_s22, %s319_s22, %s320_s23  }
   0x8   :  { %311 = dma.done.wait [#allocation3], 256  }
   0x9   :  { %312 = vsyncadd [#allocation3], 4294967040 }
   0xa   :  { %313 = dma.done.wait [#allocation6], 4096  }
   0xb   :  { %314 = vsyncadd [#allocation6], 4294963200  ;;  %v348_v0 = vld [vmem:[#allocation2] sm:$0xff]  ;;  %v45_v3 = vld [vmem:[#allocation5] sm:$0xff]  ;;  %s321_s24 = smov [#allocation7]   ;;  %s222_s28 = sshll.u32 %s377_s3, 4  ;;  %s223_s28 = int_to_ptr.hbm [resolvable:$true] %s222_s28 }
   0xc   :  { %v81_v1 = vperm.slane %v348_v0, 0  ;;  %v82_v2 = vperm.slane %v348_v0, 1  ;;  %v46_v4 = vld [vmem:[#allocation5 + $0x8] sm:$0xff]  ;;  %v83_v5 = vperm.slane %v348_v0, 2  ;;  %v47_v6 = vld [vmem:[#allocation5 + $0x10] sm:$0xff]  ;;  %v84_v7 = vperm.slane %v348_v0, 3 }
   0xd   :  { %v48_v10 = vld [vmem:[#allocation5 + $0x18] sm:$0xff]  ;;  %v61_v11 = vld [vmem:[#allocation5 + $0x80] sm:$0xff]  ;;  %v62_v12 = vld [vmem:[#allocation5 + $0x88] sm:$0xff]  ;;  %v85_v13 = vperm.slane %v348_v0, 4  ;;  %v86_v16 = vperm.slane %v348_v0, 5  ;;  %v87_v25 = vperm.slane %v348_v0, 6 }
   0xe   :  { %v113_v8 = vmul.f32 %v81_v1, %v45_v3  ;;  %v114_v9 = vmul.f32 %v82_v2, %v46_v4  ;;  %v115_v14 = vmul.f32 %v83_v5, %v47_v6  ;;  %v49_v15 = vld [vmem:[#allocation5 + $0x20] sm:$0xff]  ;;  %v63_v17 = vld [vmem:[#allocation5 + $0x90] sm:$0xff]  ;;  %v116_v18 = vmul.f32 %v84_v7, %v48_v10  ;;  %v50_v22 = vld [vmem:[#allocation5 + $0x28] sm:$0xff]  ;;  %s220_s25 = sshll.u32 %s321_s24, 4  ;;  %s221_s25 = int_to_ptr.vmem [resolvable:$true] %s220_s25 }
   0xf   :  { %v129_v20 = vmul.f32 %v81_v1, %v61_v11  ;;  %v130_v21 = vmul.f32 %v82_v2, %v62_v12  ;;  %v64_v23 = vld [vmem:[#allocation5 + $0x98] sm:$0xff]  ;;  %v117_v26 = vmul.f32 %v85_v13, %v49_v15  ;;  %v131_v28 = vmul.f32 %v83_v5, %v63_v17  ;;  %v51_v29 = vld [vmem:[#allocation5 + $0x30] sm:$0xff]  ;;  %v65_v31 = vld [vmem:[#allocation5 + $0xa0] sm:$0xff] }
  0x10   :  { %v145_v19 = vadd.f32 %v114_v9, %v113_v8  ;;  %v356_v24 = vld [vmem:[#allocation2 + $0x8] sm:$0xff]  ;;  %v88_v30 = vperm.slane %v348_v0, 7  ;;  %v118_v32 = vmul.f32 %v86_v16, %v50_v22  ;;  %v132_v34 = vmul.f32 %v84_v7, %v64_v23  ;;  %v66_v38 = vld [vmem:[#allocation5 + $0xa8] sm:$0xff]  ;;  %v53_v43 = vld [vmem:[#allocation5 + $0x40] sm:$0xff] }
  0x11   :  { %v162_v35 = vadd.f32 %v130_v21, %v129_v20  ;;  %v52_v36 = vld [vmem:[#allocation5 + $0x38] sm:$0xff]  ;;  %v89_v37 = vperm.slane %v356_v24, 0  ;;  %v119_v39 = vmul.f32 %v87_v25, %v51_v29  ;;  %v133_v41 = vmul.f32 %v85_v13, %v65_v31  ;;  %v67_v45 = vld [vmem:[#allocation5 + $0xb0] sm:$0xff]  ;;  %v54_v50 = vld [vmem:[#allocation5 + $0x48] sm:$0xff] }
  0x12   :  { %v146_v27 = vadd.f32 %v145_v19, %v115_v14  ;;  %v90_v44 = vperm.slane %v356_v24, 1  ;;  %v120_v46 = vmul.f32 %v88_v30, %v52_v36  ;;  %v134_v48 = vmul.f32 %v86_v16, %v66_v38  ;;  %v68_v52 = vld [vmem:[#allocation5 + $0xb8] sm:$0xff]  ;;  %v55_v57 = vld [vmem:[#allocation5 + $0x50] sm:$0xff]  ;;  %v69_v59 = vld [vmem:[#allocation5 + $0xc0] sm:$0xff] }
  0x13   :  { %v163_v42 = vadd.f32 %v162_v35, %v131_v28  ;;  %v91_v51 = vperm.slane %v356_v24, 2  ;;  %v121_v53 = vmul.f32 %v89_v37, %v53_v43  ;;  %v135_v55 = vmul.f32 %v87_v25, %v67_v45  ;;  %v56_v0 = vld [vmem:[#allocation5 + $0x58] sm:$0xff]  ;;  %v70_v2 = vld [vmem:[#allocation5 + $0xc8] sm:$0xff]  ;;  %v57_v7 = vld [vmem:[#allocation5 + $0x60] sm:$0xff] }
  0x14   :  { %v147_v33 = vadd.f32 %v146_v27, %v116_v18  ;;  %v92_v58 = vperm.slane %v356_v24, 3  ;;  %v122_v60 = vmul.f32 %v90_v44, %v54_v50  ;;  %v136_v62 = vmul.f32 %v88_v30, %v68_v52  ;;  %v71_v9 = vld [vmem:[#allocation5 + $0xd0] sm:$0xff]  ;;  %v58_v14 = vld [vmem:[#allocation5 + $0x68] sm:$0xff]  ;;  %v72_v16 = vld [vmem:[#allocation5 + $0xd8] sm:$0xff] }
  0x15   :  { %v164_v49 = vadd.f32 %v163_v42, %v132_v34  ;;  %v93_v1 = vperm.slane %v356_v24, 4  ;;  %v123_v3 = vmul.f32 %v91_v51, %v55_v57  ;;  %v137_v5 = vmul.f32 %v89_v37, %v69_v59  ;;  %v59_v21 = vld [vmem:[#allocation5 + $0x70] sm:$0xff]  ;;  %v73_v23 = vld [vmem:[#allocation5 + $0xe0] sm:$0xff]  ;;  %v60_v29 = vld [vmem:[#allocation5 + $0x78] sm:$0xff] }
  0x16   :  { %v148_v40 = vadd.f32 %v147_v33, %v117_v26  ;;  %v94_v8 = vperm.slane %v356_v24, 5  ;;  %v124_v10 = vmul.f32 %v92_v58, %v56_v0  ;;  %v138_v12 = vmul.f32 %v90_v44, %v70_v2  ;;  %v74_v30 = vld [vmem:[#allocation5 + $0xe8] sm:$0xff]  ;;  %v75_v35 = vld [vmem:[#allocation5 + $0xf0] sm:$0xff] }
  0x17   :  { %v165_v56 = vadd.f32 %v164_v49, %v133_v41  ;;  %v95_v15 = vperm.slane %v356_v24, 6  ;;  %v125_v17 = vmul.f32 %v93_v1, %v57_v7  ;;  %v139_v19 = vmul.f32 %v91_v51, %v71_v9  ;;  %v211_v50 = vld [vmem:[%s376_s2] sm:$0x1] }
  0x18   :  { %v149_v47 = vadd.f32 %v148_v40, %v118_v32  ;;  %v96_v22 = vperm.slane %v356_v24, 7  ;;  %v126_v25 = vmul.f32 %v94_v8, %v58_v14  ;;  %v140_v27 = vmul.f32 %v92_v58, %v72_v16  ;;  %v76_v24 = vld [vmem:[#allocation5 + $0xf8] sm:$0xff] }
  0x19   :  { %v166_v63 = vadd.f32 %v165_v56, %v134_v48  ;;  %v127_v31 = vmul.f32 %v95_v15, %v59_v21  ;;  %v141_v33 = vmul.f32 %v93_v1, %v73_v23  ;;  %v142_v38 = vmul.f32 %v94_v8, %v74_v30 }
  0x1a   :  { %v150_v54 = vadd.f32 %v149_v47, %v119_v39  ;;  %v128_v36 = vmul.f32 %v96_v22, %v60_v29  ;;  %v143_v41 = vmul.f32 %v95_v15, %v75_v35  ;;  %v144_v45 = vmul.f32 %v96_v22, %v76_v24 }
  0x1b   :  { %v167_v6 = vadd.f32 %v166_v63, %v135_v55  ;;  %vm213_vm0 = vcmask 122880  }
  0x1c   :  { %v151_v61 = vadd.f32 %v150_v54, %v120_v46 }
  0x1d   :  { %v168_v13 = vadd.f32 %v167_v6, %v136_v62 }
  0x1e   :  { %v152_v4 = vadd.f32 %v151_v61, %v121_v53 }
  0x1f   :  { %v169_v20 = vadd.f32 %v168_v13, %v137_v5 }
  0x20   :  { %v153_v11 = vadd.f32 %v152_v4, %v122_v60 }
  0x21   :  { %v170_v28 = vadd.f32 %v169_v20, %v138_v12 }
  0x22   :  { %v154_v18 = vadd.f32 %v153_v11, %v123_v3 }
  0x23   :  { %v171_v34 = vadd.f32 %v170_v28, %v139_v19 }
  0x24   :  { %v155_v26 = vadd.f32 %v154_v18, %v124_v10 }
  0x25   :  { %v172_v39 = vadd.f32 %v171_v34, %v140_v27 }
  0x26   :  { %v156_v32 = vadd.f32 %v155_v26, %v125_v17 }
  0x27   :  { %v173_v42 = vadd.f32 %v172_v39, %v141_v33 }
  0x28   :  { %v157_v37 = vadd.f32 %v156_v32, %v126_v25 }
  0x29   :  { %v174_v44 = vadd.f32 %v173_v42, %v142_v38 }
  0x2a   :  { %v158_v40 = vadd.f32 %v157_v37, %v127_v31 }
  0x2b   :  { %v175_v46 = vadd.f32 %v174_v44, %v143_v41 }
  0x2c   :  { %v159_v43 = vadd.f32 %v158_v40, %v128_v36 }
  0x2d   :  { %v176_v47 = vadd.f32 %v175_v46, %v144_v45 }
  0x2e   :  { %160 = vadd.xlane.f32.xlu0 %v159_v43 }
  0x36   :  { %177 = vadd.xlane.f32.xlu0 %v176_v47 }
  0xa1   :  { %v161_v48 = vpop.xlane.xlu0 %160 }
  0xa2   :  { %179 = vxpose.xlu1.b32.start [1/2] (short) (narrow) %v161_v48, 8 }
  0xa9   :  { %v178_v49 = vpop.xlane.xlu0 %177 }
  0xaa   :  { %180 = vxpose.xlu1.b32.end [2/2] (short) (narrow) %v178_v49, 8 }
 0x146   :  { %v195_v51 = vpop.trf.xlu1 }
 0x147   :  { %v212_v52 = vadd.f32 %v211_v50, %v195_v51 }
 0x149   :  { %214 = vst.msk [vmem:[#allocation7] sm:$0x1] %vm213_vm0, %v212_v52 }
 0x14a   :  { %225 = dma.vmem_to_hbm [thread:$0]  %s221_s25, 16, %s223_s28, [#allocation4]  }
 0x14b   :  { %315 = dma.done.wait [#allocation4], 16  }
 0x14c   :  { %316 = vsyncadd [#allocation4], 4294967280 }
 0x14d   :  { %230 = vsyncpa [#allocation3], 1 }
 0x14e   :  { %231 = vsyncpa [#allocation6], 1 }
 0x14f   :  { %232 = vsyncpa [#allocation4], 1 }

</bundles_post_ra>
